<compile_context>
chip_gen: v5e
topology: v5e:2x2
jax: 0.10.0
libtpu: 0.0.40
codegen_flags: <defaults>
</compile_context>

<pallas_src>
import functools

import jax
import jax.numpy as jnp
from jax.experimental import pallas as pl
from jax.experimental.pallas import tpu as pltpu


def _repeat_kernel(x_ref, o_ref, *, r2_in, r3):
    # x_ref: (1, C, H, W)  ->  o_ref: (1, C, H*r2_in, W*r3)
    x = x_ref[...]
    if r3 > 1:
        # Lane-axis tiling: the stored block stays lane-dense (last dim == W*r3).
        x = jnp.concatenate([x] * r3, axis=3)
    if r2_in == 1:
        o_ref[...] = x
    else:
        # Slice-wise stores along the sublane axis: never materialize the full
        # (C, H*r2, W*r3) slab in registers; each store is still full lane width.
        h = x.shape[2]
        for i in range(r2_in):
            o_ref[:, :, i * h:(i + 1) * h, :] = x


def _repeat_4d(x, r1, r2, r3):
    N, C, H, W = x.shape
    out_shape = (N, C * r1, H * r2, W * r3)
    itemsize = jnp.dtype(x.dtype).itemsize

    # Prefer putting the sublane repeat (r2) on the grid: duplication is done by
    # the output DMA, per-step VMEM stays bounded, and it adds parallel grid
    # iterations (keeps both v7x TensorCores busy even when N == r1 == 1).
    # This needs the output block's sublane dim (H) to satisfy the (8,128)
    # BlockSpec rule; otherwise fall back to in-kernel slice-wise stores.
    if r2 == 1 or H % 8 == 0:
        r2_grid, r2_in = r2, 1
    else:
        r2_grid, r2_in = 1, r2

    in_block = (1, C, H, W)
    out_block = (1, C, H * r2_in, W * r3)

    # Advisory cost: pure bandwidth (compulsory read + r1*r2*r3x write, no flops).
    total_in_bytes = N * C * H * W * itemsize
    total_out_bytes = total_in_bytes * r1 * r2 * r3
    cost = pl.CostEstimate(flops=0, transcendentals=0,
                           bytes_accessed=total_in_bytes + total_out_bytes)

    # Double-buffered per-step footprint; raise the scoped-VMEM limit only when
    # the tightest default (16 MiB on v5e) could be exceeded.
    in_block_bytes = C * H * W * itemsize
    out_block_bytes = C * H * r2_in * W * r3 * itemsize
    footprint = 2 * (in_block_bytes + out_block_bytes)
    compiler_kwargs = {}
    if footprint > 12 * 1024 * 1024:
        compiler_kwargs["vmem_limit_bytes"] = footprint + (4 << 20)
    # TODO(synk): for very large C the channel dim should also be split onto the
    # grid (target ~1-4 MiB output blocks / v7x 64 MiB VMEM); not needed here.
    # TODO(synk): when W*r3 < 128 lanes, a lane-dense flattened out_spec of
    # shape (N, C*r1, H*r2*W*r3) would avoid masked vst.msk partial stores.

    return pl.pallas_call(
        functools.partial(_repeat_kernel, r2_in=r2_in, r3=r3),
        out_shape=jax.ShapeDtypeStruct(out_shape, x.dtype),
        # n outermost, repeat axes innermost: the input block index is constant
        # across (a, b), so each batch element's input is fetched exactly once.
        grid=(N, r1, r2_grid),
        in_specs=[pl.BlockSpec(in_block, lambda n, a, b: (n, 0, 0, 0))],
        out_specs=pl.BlockSpec(out_block, lambda n, a, b: (n, a, b, 0)),
        compiler_params=pltpu.CompilerParams(
            dimension_semantics=("parallel", "parallel", "parallel"),
            **compiler_kwargs),
        cost_estimate=cost,
    )(x)


def repeat_forward(x, sizes):
    """Pallas equivalent of torch `x.repeat(1, *sizes)` (batch dim untouched)."""
    sizes = tuple(int(s) for s in sizes)
    if len(sizes) != x.ndim - 1 or x.ndim > 4:
        # TODO(synk): torch.repeat also allows len(sizes)+1 > x.ndim (adds new
        # leading dims) and >4-D tensors; only the module's typical use
        # (one repeat factor per non-batch dim, rank <= 4) is implemented.
        raise NotImplementedError(
            "repeat_forward supports 2-4D x with one repeat factor per non-batch dim")
    pad = 4 - x.ndim
    x4 = x.reshape((x.shape[0],) + (1,) * pad + x.shape[1:])
    reps = (1,) * pad + sizes
    out4 = _repeat_4d(x4, *reps)
    out_shape = (x.shape[0],) + tuple(d * s for d, s in zip(x.shape[1:], sizes))
    return out4.reshape(out_shape)


if __name__ == "__main__":
    key = jax.random.PRNGKey(0)

    # Case 1: H % 8 == 0 -> r2 on the grid, lane-dense 128-wide output rows.
    x = jax.random.normal(key, (2, 4, 16, 16), dtype=jnp.float32)
    sizes = (2, 3, 8)                       # Repeat(2, 3, 8): out = x.repeat(1, 2, 3, 8)
    out = jax.block_until_ready(repeat_forward(x, sizes))
    assert out.shape == (2, 8, 48, 128), out.shape
    ref = jnp.tile(x, (1,) + sizes)         # torch.Tensor.repeat == jnp.tile semantics
    assert bool(jnp.array_equal(out, ref)), "mismatch vs jnp.tile reference (case 1)"

    # Case 2: H % 8 != 0 -> fallback path with in-kernel slice-wise stores.
    x2 = jax.random.normal(jax.random.PRNGKey(1), (1, 2, 4, 128), dtype=jnp.float32)
    sizes2 = (2, 2, 1)
    out2 = jax.block_until_ready(repeat_forward(x2, sizes2))
    assert out2.shape == (1, 4, 8, 128), out2.shape
    ref2 = jnp.tile(x2, (1,) + sizes2)
    assert bool(jnp.array_equal(out2, ref2)), "mismatch vs jnp.tile reference (case 2)"

    print("KERNEL_OK")
</pallas_src>

<mosaic_0001>
module attributes {stable_mosaic.version = 11 : i64} {
  func.func @_repeat_kernel(%arg0: i32, %arg1: i32, %arg2: i32, %arg3: memref<1x4x16x16xf32, #tpu.memory_space<vmem>>, %arg4: memref<1x4x16x128xf32, #tpu.memory_space<vmem>>) attributes {dimension_semantics = [#tpu.dimension_semantics<parallel>, #tpu.dimension_semantics<parallel>, #tpu.dimension_semantics<parallel>], iteration_bounds = array<i64: 2, 2, 3>, scalar_prefetch = 0 : i64, scratch_operands = 0 : i64, tpu.core_type = #tpu.core_type<tc>, window_params = [{transform_indices = @transform_0, window_bounds = array<i64: 1, 4, 16, 16>}, {transform_indices = @transform_1, window_bounds = array<i64: 1, 4, 16, 128>}]} {
    %c0 = arith.constant 0 : index
    %c0_0 = arith.constant 0 : index
    %c0_1 = arith.constant 0 : index
    %c0_2 = arith.constant 0 : index
    %0 = vector.load %arg3[%c0, %c0_0, %c0_1, %c0_2] : memref<1x4x16x16xf32, #tpu.memory_space<vmem>>, vector<1x4x16x16xf32>
    %1 = tpu.concatenate %0, %0, %0, %0, %0, %0, %0, %0 in 3 : vector<1x4x16x16xf32>, vector<1x4x16x16xf32>, vector<1x4x16x16xf32>, vector<1x4x16x16xf32>, vector<1x4x16x16xf32>, vector<1x4x16x16xf32>, vector<1x4x16x16xf32>, vector<1x4x16x16xf32> -> vector<1x4x16x128xf32>
    %c0_3 = arith.constant 0 : index
    %c0_4 = arith.constant 0 : index
    %c0_5 = arith.constant 0 : index
    %c0_6 = arith.constant 0 : index
    %2 = vector.load %arg4[%c0_3, %c0_4, %c0_5, %c0_6] : memref<1x4x16x128xf32, #tpu.memory_space<vmem>>, vector<1x4x16x128xf32>
    tpu.vector_store %arg4[%c0_3, %c0_4, %c0_5, %c0_6], %1 {strides = array<i32>} : memref<1x4x16x128xf32, #tpu.memory_space<vmem>>, vector<1x4x16x128xf32>,
    return
  }
  func.func @transform_0(%arg0: i32, %arg1: i32, %arg2: i32) -> (i32, i32, i32, i32) {
    %c0_i32 = arith.constant 0 : i32
    %c0_i32_0 = arith.constant 0 : i32
    %c0_i32_1 = arith.constant 0 : i32
    %c0_i32_2 = arith.constant 0 : i32
    return %arg0, %c0_i32, %c0_i32_0, %c0_i32_1 : i32, i32, i32, i32
  }
  func.func @transform_1(%arg0: i32, %arg1: i32, %arg2: i32) -> (i32, i32, i32, i32) {
    %c0_i32 = arith.constant 0 : i32
    %c0_i32_0 = arith.constant 0 : i32
    return %arg0, %arg1, %arg2, %c0_i32 : i32, i32, i32, i32
  }
}

</mosaic_0001>

<bundles_post_ra>
// kernel: tpu_custom_call.1
= control target key start
LH: loop header
LB: loop body
LE: loop exit
PB: predicated region body
PF: predicated region fallthrough
CT: control target
= control target key end

     0   :  { %6 = vsyncpa [#allocation3], 0  ;;  %s1249_s0 = inlined_call_operand.hbm [shape: f32[2,4,16,16], index: 0, kind: input, shape index: {}]   ;;  %s1250_s1 = inlined_call_operand.hbm [shape: f32[2,8,48,128], index: 1, kind: output, shape index: {}]  }
   0x1   :  { %8 = vsyncpa [#allocation3 + $0x1], 0 }
   0x2   :  { %9 = vsyncpa [#allocation4], 0 }
   0x3   :  { %11 = vsyncpa [#allocation4 + $0x1], 0  ;;  %s884_s6 = smov 0   ;;  %s886_s7 = smov 0  }
   0x4   :  { %s888_s8 = smov 0   ;;  %s890_s9 = smov 0  }
   0x5   :  { %s892_s10 = smov 0   ;;  %s894_s11 = smov 0  }
   0x6   :  { %s896_s12 = smov 0   ;;  %s898_s13 = smov 0  }
   0x7   :  { %s900_s14 = smov 0   ;;  %s902_s15 = smov 0  }
   0x8   :  { %s904_s16 = smov 0   ;;  %s906_s17 = smov 0  }
   0x9   :  { %s908_s18 = smov 0  }
   0xa LB: > { %1256 = sst [smem:[#allocation10_spill]] %s844_s15  ;;  %s556_s19 = sadd.s32 4294967295, %s856_s18   ;;  %s856_s18 = sphi %s908_s18, %s17_s18   ;;  %s852_s17 = sphi %s906_s17, %s1279_s17   ;;  %s848_s16 = sphi %s904_s16, %s1270_s16   ;;  %s844_s15 = sphi %s902_s15, %s1269_s15   ;;  %s840_s14 = sphi %s900_s14, %s1278_s14   ;;  %s836_s13 = sphi %s898_s13, %s1268_s13   ;;  %s832_s12 = sphi %s896_s12, %s1267_s12   ;;  %s828_s11 = sphi %s894_s11, %s1277_s11   ;;  %s824_s10 = sphi %s892_s10, %s1276_s10   ;;  %s820_s9 = sphi %s890_s9, %s1275_s9   ;;  %s816_s8 = sphi %s888_s8, %s1274_s8   ;;  %s812_s7 = sphi %s886_s7, %s1273_s7   ;;  %s808_s6 = sphi %s884_s6, %s1272_s6  }
   0xb   : > { %1257 = sst [smem:[#allocation11_spill]] %s848_s16  ;;  %s557_s20 = sadd.s32 4294967294, %s856_s18  }
   0xc   : > { %s29_s21 = sadd.s32 1, %s844_s15  ;;  %s32_s22 = sadd.s32 1, %s848_s16 }
   0xd   : > { %p30_p0 = scmp.ge.s32.totalorder %s29_s21, 3  ;;  %s36_s23 = sadd.s32 1, %s852_s17 }
   0xe   : > { %s43_s24 = sadd.s32 1, %s828_s11  ;;  %p50_p1 = scmp.ne.s32.totalorder %s828_s11, %s824_s10 }
   0xf   : > { %s1281_s21 = smov (%p30_p0, %s29_s21), 0  ;;  %s1283_s22 = smov (!%p30_p0, %s32_s22), %s848_s16 }
  0x10   : > { %1258 = sst [smem:[#allocation12_spill]] %s1281_s21  ;;  %p51_p2 = scmp.eq.s32.totalorder %s856_s18, 0 }
  0x11   : > { %p56_p3 = scmp.ne.s32.totalorder %s824_s10, %s820_s9  ;;  %p34_p4 = scmp.ge.s32.totalorder %s1283_s22, 2 }
  0x12   : > { %p57_p5 = scmp.eq.s32.totalorder %s556_s19, 0  ;;  %p960_p6 = por %p51_p2, %p50_p1 }
  0x13   : > { %s69_s26 = ssub.s32 %s844_s15, %s1281_s21  ;;  %s1285_s22 = smov (%p34_p4, %s1283_s22), 0 }
  0x14   : > { %1260 = sst [smem:[#allocation13_spill]] %s1285_s22  ;;  %s1287_s23 = smov (!%p34_p4, %s36_s23), %s852_s17 }
  0x15   : > { %p969_p7 = por %p57_p5, %p56_p3  ;;  %s67_s28 = ssub.s32 %s848_s16, %s1285_s22 }
  0x16   : > { %p38_p8 = scmp.ge.s32.totalorder %s1287_s23, 2  ;;  %s73_s29 = sadd.s32 1, %s816_s8 }
  0x17   : > { %p83_p9 = scmp.ne.s32.totalorder %s816_s8, %s812_s7  ;;  %p84_p10 = scmp.eq.s32.totalorder %s556_s19, 11 }
  0x18   : > { %s1289_s23 = smov (%p38_p8, %s1287_s23), 0  ;;  %p89_p12 = scmp.ne.s32.totalorder %s812_s7, %s808_s6 }
  0x19   : > { %1262 = sst [smem:[#allocation14_spill]] %s1289_s23  ;;  %p980_p11 = por %p84_p10, %p83_p9 }
  0x1a   : > { %s40_s2 = ssub.s32 %s852_s17, %s1289_s23  ;;  %p90_p13 = scmp.eq.s32.totalorder %s557_s20, 11 }
  0x1b   : > { %p41_p0 = scmp.eq.s32.totalorder %s40_s2, 0  ;;  %s68_s3 = sor.u32 %s67_s28, %s40_s2 }
  0x1c   : > { %s70_s4 = sor.u32 %s69_s26, %s68_s3  ;;  %p988_p1 = por %p90_p13, %p89_p12 }
  0x1d   : > { %s993_s9 = scalar_select %p41_p0, %s828_s11, %s43_s24  }
  0x1e   : > { %p71_p2 = scmp.eq.s32.totalorder %s70_s4, 0  ;;  %p594_p3 = scmp.lt.s32.totalorder %s856_s18, 12 }
  0x1f   : > { %s110_s19 = sand.u32 1, %s828_s11   ;;  %s573_s23 = sshll.u32 %s852_s17, 6 }
  0x20   : > { %s998_s22 = scalar_select %p71_p2, %s816_s8, %s73_s29  }
  0x21   : > { %s560_s21 = sshll.u32 %s110_s19, 6  ;;  %s119_s28 = scalar_lea.hbm %s1249_s0, %s573_s23 }
  0x22   : > { %s114_s26 = scalar_lea.vmem [#allocation2], %s560_s21  ;;  %s120_s3 = sshll.u32 %s119_s28, 4  ;;  %s121_s3 = int_to_ptr.hbm [resolvable:$true] %s120_s3 }
  0x23   : > { %s122_s2 = sshll.u32 %s114_s26, 4  ;;  %p587_p4 = pnand %p594_p3, %p960_p6  ;;  %s123_s2 = int_to_ptr.vmem [resolvable:$true] %s122_s2 }
  0x24   : > { %p563_p5 = scmp.ge.s32.totalorder %s856_s18, 1  ;;  %s111_s24 = scalar_lea.sflag [#allocation3], %s110_s19 }
  0x25   : > { %s858_s4 = smov 128   ;;  %s859_s15 = smov 8  }
  0x26   : > { %589 = dma.hbm_to_vmem [thread:$0]  (!%p587_p4), %s121_s3, 1024, %s123_s2, %s111_s24, %s858_s4, %s858_s4, %s859_s15  }
  0x27   : > { %p130_p8 = scmp.lt.s32.totalorder %s856_s18, 13 }
  0x29   : > { %p131_p9 = pnand %p563_p5, %p130_p8 }
  0x2a   : > { %s136_s29 = sand.u32 (!%p131_p9), 1, %s824_s10  }
  0x2b   : > { %134 = sbr.rel (%p131_p9) target bundleno = 324 (0x144), region = 24  ;;  %s564_s16 = sshll.u32 (!%p131_p9), %s136_s29, 6 }
  0x2c   : > { %s137_s23 = scalar_lea.sflag (!%p131_p9), [#allocation3], %s136_s29  ;;  %s140_s21 = scalar_lea.vmem (!%p131_p9), [#allocation2], %s564_s16 }
  0x30   : > { %799 = dma.done.wait (%p969_p7), %s137_s23, 1024  }
  0x31   : > { %801 = vsyncadd (%p969_p7), %s137_s23, 4294966272  ;;  %v1013_v0 = vld [vmem:[%s140_s21 + $0x10] sm:$0xff]  ;;  %v1015_v1 = vld [vmem:[%s140_s21] sm:$0xff]  ;;  %s860_s25 = smov 16   ;;  %s861_s15 = smov 32   ;;  %vm346_vm0 = vcmask 130048  }
  0x32   : > { %182 = vrot.lane.b32.xlu1 %v1013_v0, %s860_s25  ;;  %178 = vrot.lane.b32.xlu0 %v1015_v1, %s860_s25  ;;  %v1019_v2 = vld [vmem:[%s140_s21 + $0x20] sm:$0xff]  ;;  %v1022_v3 = vld [vmem:[%s140_s21 + $0x18] sm:$0xff]  ;;  %s862_s27 = smov 48   ;;  %s863_s19 = smov 64   ;;  %vm355_vm1 = vcmask 261120   ;;  %vm364_vm2 = vcmask 392192  }
  0x33   : > { %186 = vrot.lane.b32.xlu2 %v1019_v2, %s860_s25  ;;  %v1024_v4 = vld [vmem:[%s140_s21 + $0x8] sm:$0xff]  ;;  %v1031_v6 = vld [vmem:[%s140_s21 + $0x38] sm:$0xff]  ;;  %v1033_v7 = vld [vmem:[%s140_s21 + $0x30] sm:$0xff]  ;;  %s864_s20 = smov 80   ;;  %s157_s28 = sand.u32 1, %s812_s7   ;;  %vm373_vm3 = vcmask 523264  }
  0x34   : > { %v1026_v5 = vld [vmem:[%s140_s21 + $0x28] sm:$0xff]  ;;  %s865_s26 = smov 96   ;;  %s866_s2 = smov 112   ;;  %vm382_vm4 = vcmask 654336   ;;  %vm400_vm5 = vcmask 916480   ;;  %vm391_vm6 = vcmask 785408  }
  0x35   : > { %s565_s3 = sshll.u32 %s157_s28, 6  ;;  %s418_s4 = scalar_lea.sflag [#allocation4], %s157_s28 }
  0x36   : > { %s1133_s24 = scalar_lea.vmem [#allocation5], %s565_s3 }
  0x3a   : > { %184 = vrot.lane.b32.xlu1 %v1022_v3, %s860_s25  ;;  %180 = vrot.lane.b32.xlu0 %v1024_v4, %s860_s25 }
  0x3b   : > { %188 = vrot.lane.b32.xlu2 %v1026_v5, %s860_s25 }
  0x42   : > { %192 = vrot.lane.b32.xlu1 %v1031_v6, %s860_s25  ;;  %190 = vrot.lane.b32.xlu0 %v1033_v7, %s860_s25 }
  0x43   : > { %202 = vrot.lane.b32.xlu2 %v1015_v1, %s861_s15 }
  0x4a   : > { %206 = vrot.lane.b32.xlu1 %v1013_v0, %s861_s15  ;;  %204 = vrot.lane.b32.xlu0 %v1024_v4, %s861_s15 }
  0x4b   : > { %208 = vrot.lane.b32.xlu2 %v1022_v3, %s861_s15 }
  0x52   : > { %212 = vrot.lane.b32.xlu1 %v1026_v5, %s861_s15  ;;  %210 = vrot.lane.b32.xlu0 %v1019_v2, %s861_s15 }
  0x53   : > { %214 = vrot.lane.b32.xlu2 %v1033_v7, %s861_s15 }
  0x5a   : > { %226 = vrot.lane.b32.xlu1 %v1015_v1, %s862_s27  ;;  %216 = vrot.lane.b32.xlu0 %v1031_v6, %s861_s15 }
  0x5b   : > { %228 = vrot.lane.b32.xlu2 %v1024_v4, %s862_s27 }
  0x62   : > { %232 = vrot.lane.b32.xlu1 %v1022_v3, %s862_s27  ;;  %230 = vrot.lane.b32.xlu0 %v1013_v0, %s862_s27 }
  0x63   : > { %234 = vrot.lane.b32.xlu2 %v1019_v2, %s862_s27 }
  0x6a   : > { %238 = vrot.lane.b32.xlu1 %v1033_v7, %s862_s27  ;;  %236 = vrot.lane.b32.xlu0 %v1026_v5, %s862_s27 }
  0x6b   : > { %240 = vrot.lane.b32.xlu2 %v1031_v6, %s862_s27 }
  0x72   : > { %252 = vrot.lane.b32.xlu1 %v1024_v4, %s863_s19  ;;  %250 = vrot.lane.b32.xlu0 %v1015_v1, %s863_s19 }
  0x73   : > { %254 = vrot.lane.b32.xlu2 %v1013_v0, %s863_s19 }
  0x7a   : > { %258 = vrot.lane.b32.xlu1 %v1019_v2, %s863_s19  ;;  %256 = vrot.lane.b32.xlu0 %v1022_v3, %s863_s19 }
  0x7b   : > { %260 = vrot.lane.b32.xlu2 %v1026_v5, %s863_s19 }
  0x82   : > { %264 = vrot.lane.b32.xlu1 %v1031_v6, %s863_s19  ;;  %262 = vrot.lane.b32.xlu0 %v1033_v7, %s863_s19 }
  0x83   : > { %274 = vrot.lane.b32.xlu2 %v1015_v1, %s864_s20 }
  0x8a   : > { %278 = vrot.lane.b32.xlu1 %v1013_v0, %s864_s20  ;;  %276 = vrot.lane.b32.xlu0 %v1024_v4, %s864_s20 }
  0x8b   : > { %280 = vrot.lane.b32.xlu2 %v1022_v3, %s864_s20 }
  0x8d   : > { %v187_v8 = vpop.permute.xlu2 %186 }
  0x8e   : > { %v351_v34 = vsel %vm346_vm0, %v1019_v2, %v187_v8 }
  0x92   : > { %284 = vrot.lane.b32.xlu1 %v1026_v5, %s864_s20  ;;  %282 = vrot.lane.b32.xlu0 %v1019_v2, %s864_s20 }
  0x93   : > { %286 = vrot.lane.b32.xlu2 %v1033_v7, %s864_s20 }
  0x95   : > { %v189_v9 = vpop.permute.xlu2 %188 }
  0x96   : > { %v352_v35 = vsel %vm346_vm0, %v1026_v5, %v189_v9 }
  0x9a   : > { %298 = vrot.lane.b32.xlu1 %v1015_v1, %s865_s26  ;;  %288 = vrot.lane.b32.xlu0 %v1031_v6, %s864_s20 }
  0x9b   : > { %300 = vrot.lane.b32.xlu2 %v1024_v4, %s865_s26 }
  0x9d   : > { %v203_v10 = vpop.permute.xlu2 %202 }
  0xa2   : > { %304 = vrot.lane.b32.xlu1 %v1022_v3, %s865_s26  ;;  %302 = vrot.lane.b32.xlu0 %v1013_v0, %s865_s26 }
  0xa3   : > { %306 = vrot.lane.b32.xlu2 %v1019_v2, %s865_s26 }
  0xa4   : > { %v183_v11 = vpop.permute.xlu1 %182  ;;  %v179_v12 = vpop.permute.xlu0 %178 }
  0xa5   : > { %v347_v13 = vsel %vm346_vm0, %v1015_v1, %v179_v12  ;;  %v209_v14 = vpop.permute.xlu2 %208  ;;  %v349_v26 = vsel %vm346_vm0, %v1013_v0, %v183_v11 }
  0xa6   : > { %v356_v15 = vsel %vm355_vm1, %v347_v13, %v203_v10 }
  0xaa   : > { %310 = vrot.lane.b32.xlu1 %v1033_v7, %s865_s26  ;;  %308 = vrot.lane.b32.xlu0 %v1026_v5, %s865_s26 }
  0xab   : > { %312 = vrot.lane.b32.xlu2 %v1031_v6, %s865_s26 }
  0xac   : > { %v185_v16 = vpop.permute.xlu1 %184  ;;  %v181_v17 = vpop.permute.xlu0 %180 }
  0xad   : > { %v350_v18 = vsel %vm346_vm0, %v1022_v3, %v185_v16  ;;  %v215_v19 = vpop.permute.xlu2 %214  ;;  %v348_v27 = vsel %vm346_vm0, %v1024_v4, %v181_v17 }
  0xae   : > { %v359_v20 = vsel %vm355_vm1, %v350_v18, %v209_v14 }
  0xb2   : > { %324 = vrot.lane.b32.xlu1 %v1024_v4, %s866_s2  ;;  %322 = vrot.lane.b32.xlu0 %v1015_v1, %s866_s2 }
  0xb3   : > { %326 = vrot.lane.b32.xlu2 %v1013_v0, %s866_s2 }
  0xb4   : > { %v193_v21 = vpop.permute.xlu1 %192  ;;  %v191_v22 = vpop.permute.xlu0 %190 }
  0xb5   : > { %v353_v23 = vsel %vm346_vm0, %v1033_v7, %v191_v22  ;;  %v229_v24 = vpop.permute.xlu2 %228  ;;  %v354_v42 = vsel %vm346_vm0, %v1031_v6, %v193_v21 }
  0xb6   : > { %v362_v25 = vsel %vm355_vm1, %v353_v23, %v215_v19 }
  0xba   : > { %330 = vrot.lane.b32.xlu1 %v1019_v2, %s866_s2  ;;  %328 = vrot.lane.b32.xlu0 %v1022_v3, %s866_s2 }
  0xbb   : > { %332 = vrot.lane.b32.xlu2 %v1026_v5, %s866_s2 }
  0xbc   : > { %v207_v28 = vpop.permute.xlu1 %206  ;;  %v205_v29 = vpop.permute.xlu0 %204 }
  0xbd   : > { %v358_v30 = vsel %vm355_vm1, %v349_v26, %v207_v28  ;;  %v357_v31 = vsel %vm355_vm1, %v348_v27, %v205_v29  ;;  %v235_v32 = vpop.permute.xlu2 %234 }
  0xbe   : > { %v1100_v33 = vsel %vm364_vm2, %v357_v31, %v229_v24 }
  0xc2   : > { %336 = vrot.lane.b32.xlu1 %v1031_v6, %s866_s2  ;;  %334 = vrot.lane.b32.xlu0 %v1033_v7, %s866_s2 }
  0xc4   : > { %v213_v36 = vpop.permute.xlu1 %212  ;;  %v211_v37 = vpop.permute.xlu0 %210 }
  0xc5   : > { %v361_v38 = vsel %vm355_vm1, %v352_v35, %v213_v36  ;;  %v360_v39 = vsel %vm355_vm1, %v351_v34, %v211_v37  ;;  %v241_v40 = vpop.permute.xlu2 %240 }
  0xc6   : > { %v1111_v41 = vsel %vm364_vm2, %v360_v39, %v235_v32 }
  0xcc   : > { %v227_v43 = vpop.permute.xlu1 %226  ;;  %v217_v44 = vpop.permute.xlu0 %216 }
  0xcd   : > { %v365_v45 = vsel %vm364_vm2, %v356_v15, %v227_v43  ;;  %v363_v46 = vsel %vm355_vm1, %v354_v42, %v217_v44  ;;  %v255_v47 = vpop.permute.xlu2 %254 }
  0xce   : > { %v1118_v48 = vsel %vm364_vm2, %v363_v46, %v241_v40 }
  0xd4   : > { %v233_v49 = vpop.permute.xlu1 %232  ;;  %v231_v50 = vpop.permute.xlu0 %230 }
  0xd5   : > { %v368_v51 = vsel %vm364_vm2, %v359_v20, %v233_v49  ;;  %v261_v52 = vpop.permute.xlu2 %260  ;;  %v367_v10 = vsel %vm364_vm2, %v358_v30, %v231_v50 }
  0xd6   : > { %v376_v12 = vsel %vm373_vm3, %v367_v10, %v255_v47 }
  0xdc   : > { %v239_v53 = vpop.permute.xlu1 %238  ;;  %v237_v54 = vpop.permute.xlu0 %236 }
  0xdd   : > { %v1122_v55 = vsel %vm364_vm2, %v362_v25, %v239_v53  ;;  %v275_v56 = vpop.permute.xlu2 %274  ;;  %v370_v18 = vsel %vm364_vm2, %v361_v38, %v237_v54 }
  0xde   : > { %v379_v19 = vsel %vm373_vm3, %v370_v18, %v261_v52 }
  0xe4   : > { %v253_v57 = vpop.permute.xlu1 %252  ;;  %v251_v58 = vpop.permute.xlu0 %250 }
  0xe5   : > { %v281_v59 = vpop.permute.xlu2 %280  ;;  %v375_v26 = vsel %vm373_vm3, %v1100_v33, %v253_v57  ;;  %v374_v27 = vsel %vm373_vm3, %v365_v45, %v251_v58 }
  0xe6   : > { %v383_v29 = vsel %vm382_vm4, %v374_v27, %v275_v56 }
  0xec   : > { %v259_v60 = vpop.permute.xlu1 %258  ;;  %v257_v61 = vpop.permute.xlu0 %256 }
  0xed   : > { %v1124_v62 = vpop.permute.xlu2 %286  ;;  %v378_v33 = vsel %vm373_vm3, %v1111_v41, %v259_v60  ;;  %v377_v37 = vsel %vm373_vm3, %v368_v51, %v257_v61 }
  0xee   : > { %v386_v39 = vsel %vm382_vm4, %v377_v37, %v281_v59 }
  0xf4   : > { %v265_v63 = vpop.permute.xlu1 %264  ;;  %v263_v0 = vpop.permute.xlu0 %262 }
  0xf5   : > { %v301_v1 = vpop.permute.xlu2 %300  ;;  %v381_v41 = vsel %vm373_vm3, %v1118_v48, %v265_v63  ;;  %v380_v47 = vsel %vm373_vm3, %v1122_v55, %v263_v0 }
  0xf6   : > { %v389_v50 = vsel %vm382_vm4, %v380_v47, %v1124_v62 }
  0xfc   : > { %v279_v2 = vpop.permute.xlu1 %278  ;;  %v277_v3 = vpop.permute.xlu0 %276 }
  0xfd   : > { %v307_v4 = vpop.permute.xlu2 %306  ;;  %v385_v13 = vsel %vm382_vm4, %v376_v12, %v279_v2  ;;  %v384_v28 = vsel %vm382_vm4, %v375_v26, %v277_v3 }
  0xfe   : > { %v393_v30 = vsel %vm391_vm6, %v384_v28, %v301_v1 }
 0x104   : > { %v285_v5 = vpop.permute.xlu1 %284  ;;  %v283_v6 = vpop.permute.xlu0 %282 }
 0x105   : > { %v313_v7 = vpop.permute.xlu2 %312  ;;  %v388_v21 = vsel %vm382_vm4, %v379_v19, %v285_v5  ;;  %v387_v38 = vsel %vm382_vm4, %v378_v33, %v283_v6 }
 0x106   : > { %v396_v40 = vsel %vm391_vm6, %v387_v38, %v307_v4 }
 0x10c   : > { %v299_v8 = vpop.permute.xlu1 %298  ;;  %v289_v9 = vpop.permute.xlu0 %288 }
 0x10d   : > { %v327_v11 = vpop.permute.xlu2 %326  ;;  %v392_v31 = vsel %vm391_vm6, %v383_v29, %v299_v8  ;;  %v390_v49 = vsel %vm382_vm4, %v381_v41, %v289_v9 }
 0x10e   : > { %v399_v51 = vsel %vm391_vm6, %v390_v49, %v313_v7 }
 0x114   : > { %v305_v14 = vpop.permute.xlu1 %304  ;;  %v303_v15 = vpop.permute.xlu0 %302 }
 0x115   : > { %v394_v16 = vsel %vm391_vm6, %v385_v13, %v303_v15  ;;  %v333_v20 = vpop.permute.xlu2 %332  ;;  %v395_v42 = vsel %vm391_vm6, %v386_v39, %v305_v14 }
 0x116   : > { %v403_v17 = vsel %vm400_vm5, %v394_v16, %v327_v11 }
 0x117   : > { %411 = vst [vmem:[%s1133_s24 + $0x10] sm:$0xff] %v403_v17 }
 0x11c   : > { %v311_v22 = vpop.permute.xlu1 %310  ;;  %v309_v23 = vpop.permute.xlu0 %308 }
 0x11d   : > { %v397_v24 = vsel %vm391_vm6, %v388_v21, %v309_v23  ;;  %v398_v52 = vsel %vm391_vm6, %v389_v50, %v311_v22 }
 0x11e   : > { %v406_v25 = vsel %vm400_vm5, %v397_v24, %v333_v20 }
 0x11f   : > { %414 = vst [vmem:[%s1133_s24 + $0x28] sm:$0xff] %v406_v25 }
 0x124   : > { %v325_v32 = vpop.permute.xlu1 %324  ;;  %v323_v34 = vpop.permute.xlu0 %322 }
 0x125   : > { %v402_v35 = vsel %vm400_vm5, %v393_v30, %v325_v32  ;;  %v401_v36 = vsel %vm400_vm5, %v392_v31, %v323_v34 }
 0x126   : > { %410 = vst [vmem:[%s1133_s24 + $0x8] sm:$0xff] %v402_v35 }
 0x127   : > { %409 = vst [vmem:[%s1133_s24] sm:$0xff] %v401_v36 }
 0x12c   : > { %v331_v43 = vpop.permute.xlu1 %330  ;;  %v329_v44 = vpop.permute.xlu0 %328 }
 0x12d   : > { %v405_v45 = vsel %vm400_vm5, %v396_v40, %v331_v43  ;;  %v404_v46 = vsel %vm400_vm5, %v395_v42, %v329_v44 }
 0x12e   : > { %413 = vst [vmem:[%s1133_s24 + $0x20] sm:$0xff] %v405_v45 }
 0x12f   : > { %412 = vst [vmem:[%s1133_s24 + $0x18] sm:$0xff] %v404_v46 }
 0x134   : > { %v337_v53 = vpop.permute.xlu1 %336  ;;  %v335_v54 = vpop.permute.xlu0 %334 }
 0x135   : > { %v408_v56 = vsel %vm400_vm5, %v399_v51, %v337_v53  ;;  %v407_v57 = vsel %vm400_vm5, %v398_v52, %v335_v54 }
 0x136   : > { %416 = vst [vmem:[%s1133_s24 + $0x38] sm:$0xff] %v408_v56 }
 0x137   : > { %415 = vst [vmem:[%s1133_s24 + $0x30] sm:$0xff] %v407_v57 }
 0x138   : > { %s568_s29 = sshll.u32 %s832_s12, 1  ;;  %s574_s16 = smul.u32 24, %s836_s13 }
 0x139   : > { %s575_s23 = smul.u32 48, %s840_s14  ;;  %s445_s21 = sshll.u32 %s1133_s24, 4  ;;  %s446_s21 = int_to_ptr.vmem [resolvable:$true] %s445_s21 }
 0x13a   : > { %s430_s25 = sadd.s32 %s574_s16, %s568_s29  ;;  %s867_s19 = smov 256  }
 0x13b   : > { %s432_s15 = sadd.s32 %s575_s23, %s430_s25  ;;  %578 = sst [smem:[#allocation7]] (%p980_p11), %s867_s19 }
 0x13c   : > { %s570_s27 = sshll.u32 %s432_s15, 3  ;;  %s868_s2 = smov 768  }
 0x13d   : > { %s434_s26 = scalar_lea.hbm %s1250_s1, %s570_s27  ;;  %579 = sst [smem:[#allocation7 + $0x1]] (%p980_p11), %s868_s2 }
 0x13e   : > { %s447_s12 = sshll.u32 %s434_s26, 4  ;;  %s869_s13 = smov 2   ;;  %s448_s12 = int_to_ptr.hbm [resolvable:$true] %s447_s12 }
 0x13f   : > { %580 = sst [smem:[#allocation7 + $0x2]] (%p980_p11), %s869_s13  ;;  %s870_s14 = smov 128  }
 0x140   : > { %581 = sst [smem:[#allocation7 + $0x3]] (%p980_p11), %s870_s14  ;;  %s871_s3 = smov 8  }
 0x141   : > { %582 = sst [smem:[#allocation7 + $0x4]] (%p980_p11), %s870_s14  ;;  %s872_s24 = smov [#allocation6]  }
 0x142   : > { %583 = sst [smem:[#allocation7 + $0x5]] (%p980_p11), %s871_s3  ;;  %s873_s29 = smov 0  }
 0x143   : > { %584 = dma.general (%p980_p11), %s446_s21, 1024, %s448_s12, %s418_s4, %s872_s24, [#allocation7], %s873_s29, 0  }
 0x144 PF: > { %p595_p6 = scmp.ge.s32.totalorder %s856_s18, 2  ;;  %s475_s16 = sand.u32 1, %s808_s6  }
 0x145   : > { %s476_s23 = scalar_lea.sflag [#allocation4], %s475_s16 }
 0x146   : > { %p591_p7 = pnand %p595_p6, %p988_p1 }
 0x148   : > { %p592_p10 = pneg %p591_p7 }
 0x14a   : > { %803 = dma.done.wait (%p592_p10), %s476_s23, 1024  }
 0x14b   : > { %805 = vsyncadd (%p592_p10), %s476_s23, 4294966272  ;;  %s17_s18 = sadd.s32 1, %s856_s18   ;;  %s1266_s30 = smov %s993_s9 }
 0x14c   : > { %p1205_p12 = scmp.ge.s32.totalorder %s17_s18, 14   ;;  %s1267_s12 = sld [smem:[#allocation10_spill]] }
 0x14d   : > { %s1268_s13 = sld [smem:[#allocation11_spill]]  ;;  %s1272_s6 = smov %s812_s7 }
 0x14e   : > { %s1269_s15 = sld [smem:[#allocation12_spill]]  ;;  %s1273_s7 = smov %s816_s8 }
 0x14f   : > { %s1270_s16 = sld [smem:[#allocation13_spill]]  ;;  %s1274_s8 = smov %s998_s22 }
 0x150   : > { %s1271_s5 = sld [smem:[#allocation14_spill]]  ;;  %s1275_s9 = smov %s824_s10 }
 0x151   : > { %s1276_s10 = smov %s828_s11  ;;  %s1277_s11 = smov %s1266_s30 }
 0x152   : > { %s1278_s14 = smov %s852_s17  ;;  %16 = sbr.rel (!%p1205_p12) target bundleno = 10 (0xa), region = 74 }
 0x156   : > { %s1279_s17 = smov %s1271_s5 }
 0x157   :  { %482 = vsyncpa [#allocation3], 1 }
 0x158   :  { %484 = vsyncpa [#allocation3 + $0x1], 1 }
 0x159   :  { %485 = vsyncpa [#allocation4], 1 }
 0x15a   :  { %487 = vsyncpa [#allocation4 + $0x1], 1 }

</bundles_post_ra>
